<compile_context>
chip_gen: v6e
topology: v6e:2x2x1
jax: 0.10.0
libtpu: 0.0.40
codegen_flags: <defaults>
</compile_context>

<pallas_src>
import functools

import jax
import jax.numpy as jnp
import numpy as np
from jax.experimental import pallas as pl
from jax.experimental.pallas import tpu as pltpu

POOL_SIZE = 3  # nn.AvgPool2d(3, stride=1, padding=1, count_include_pad=False)


def _pooling_kernel(aux_ref, x_ref, o_ref, *, pad, w, hw):
    # aux_ref: (4*pad + 2, HW) f32 resident constants:
    #   rows 2*(k-1), 2*(k-1)+1           : W-dir masks for offsets -k / +k   (k = 1..pad)
    #   rows 2*pad + 2*(k-1), ... + 1     : H-dir masks for offsets -k*W / +k*W
    #   row  4*pad                        : reciprocal of the in-bounds tap count
    #   row  4*pad + 1                    : flattened position index (f32), roll probe
    # x_ref / o_ref: (C_TILE, HW)
    x = x_ref[...].astype(jnp.float32)

    # Probe the roll convention once: under numpy-roll semantics roll(pos, 1)[1] == pos[0] == 0.
    pos = aux_ref[4 * pad + 1:4 * pad + 2, :]
    probe = pltpu.roll(pos, shift=1, axis=1)
    sel = (probe[0:1, 1:2] == 0.0).astype(jnp.float32)   # (1, 1): 1.0 iff numpy convention

    def masked_neighbor_sum(v, step, mask_base_row):
        # v + sum_{k=1..pad} ( v[p - k*step] * mask_neg_k + v[p + k*step] * mask_pos_k )
        acc = v
        for k in range(1, pad + 1):
            r = mask_base_row + 2 * (k - 1)
            m_neg = aux_ref[r:r + 1, :]        # 1.0 where the -k*step neighbor is in-bounds
            m_pos = aux_ref[r + 1:r + 2, :]    # 1.0 where the +k*step neighbor is in-bounds
            d = k * step
            roll_a = pltpu.roll(v, shift=d % hw, axis=1)      # v[p - d] under numpy convention
            roll_b = pltpu.roll(v, shift=(-d) % hw, axis=1)   # v[p + d] under numpy convention
            # Pair each rolled array with the right mask regardless of roll direction.
            ma = m_neg * sel + m_pos * (1.0 - sel)            # (1, HW)
            mb = m_pos * sel + m_neg * (1.0 - sel)
            acc = acc + roll_a * ma + roll_b * mb
        return acc

    row_sum = masked_neighbor_sum(x, 1, 0)                 # within-row (W direction)
    win_sum = masked_neighbor_sum(row_sum, w, 2 * pad)     # across rows (H direction)

    inv_cnt = aux_ref[4 * pad:4 * pad + 1, :]              # hoisted reciprocal divisor
    o_ref[...] = (win_sum * inv_cnt - x).astype(o_ref.dtype)


def pooling_forward(x, pool_size=POOL_SIZE, block_bytes=1 << 20):
    """x: (N, C, H, W) -> AvgPool2d(k, 1, k//2, count_include_pad=False)(x) - x."""
    if pool_size % 2 != 1:
        raise ValueError("pool_size must be odd (PoolFormer uses 3).")
    pad = pool_size // 2
    N, C, H, W = x.shape
    NC, HW = N * C, H * W

    # ---- grid-invariant constants: built once, DMA'd once (constant index_map) ----
    cols = jnp.arange(W, dtype=jnp.int32)
    rows = jnp.arange(H, dtype=jnp.int32)
    aux_rows = []
    for k in range(1, pad + 1):                                    # W-direction edge masks
        aux_rows.append(jnp.tile((cols >= k).astype(jnp.float32), H))
        aux_rows.append(jnp.tile((cols <= W - 1 - k).astype(jnp.float32), H))
    for k in range(1, pad + 1):                                    # H-direction edge masks
        aux_rows.append(jnp.repeat((rows >= k).astype(jnp.float32), W))
        aux_rows.append(jnp.repeat((rows <= H - 1 - k).astype(jnp.float32), W))
    cnt_w = jnp.minimum(cols, pad) + 1 + jnp.minimum(W - 1 - cols, pad)
    cnt_h = jnp.minimum(rows, pad) + 1 + jnp.minimum(H - 1 - rows, pad)
    cnt = (cnt_h[:, None] * cnt_w[None, :]).reshape(HW)
    aux_rows.append(1.0 / cnt.astype(jnp.float32))                 # count_include_pad=False
    aux_rows.append(jnp.arange(HW, dtype=jnp.float32))             # position row (roll probe)
    aux = jnp.stack(aux_rows, axis=0)                              # (4*pad + 2, HW)

    # ---- channel blocking: ~1 MiB of flattened channels per grid step ----
    row_bytes = HW * x.dtype.itemsize
    c_tile = max(1, int(block_bytes) // max(1, row_bytes))
    c_tile = min(c_tile, NC)
    if c_tile < NC:
        c_tile = max(8, (c_tile // 8) * 8)   # keep the sublane dim 8-aligned
        c_tile = min(c_tile, NC)
    grid = (pl.cdiv(NC, c_tile),)

    xf = x.reshape(NC, HW)
    kernel = functools.partial(_pooling_kernel, pad=pad, w=W, hw=HW)
    out = pl.pallas_call(
        kernel,
        out_shape=jax.ShapeDtypeStruct((NC, HW), x.dtype),
        grid=grid,
        in_specs=[
            pl.BlockSpec((4 * pad + 2, HW), lambda i: (0, 0)),     # resident constants
            pl.BlockSpec((c_tile, HW), lambda i: (i, 0)),
        ],
        out_specs=pl.BlockSpec((c_tile, HW), lambda i: (i, 0)),
        compiler_params=pltpu.CompilerParams(
            dimension_semantics=("parallel",),
            vmem_limit_bytes=32 * 1024 * 1024,
        ),
    )(aux, xf)
    return out.reshape(N, C, H, W)


def _reference(x, pool_size=POOL_SIZE):
    """Pure-JAX reference matching AvgPool2d(count_include_pad=False)(x) - x."""
    pad = pool_size // 2
    N, C, H, W = x.shape
    xp = jnp.pad(x, ((0, 0), (0, 0), (pad, pad), (pad, pad)))
    ones = jnp.pad(jnp.ones((1, 1, H, W), x.dtype),
                   ((0, 0), (0, 0), (pad, pad), (pad, pad)))
    s = jnp.zeros_like(x)
    c = jnp.zeros((1, 1, H, W), x.dtype)
    for dy in range(pool_size):
        for dx in range(pool_size):
            s = s + xp[:, :, dy:dy + H, dx:dx + W]
            c = c + ones[:, :, dy:dy + H, dx:dx + W]
    return s / c - x


if __name__ == "__main__":
    key = jax.random.PRNGKey(0)
    x = jax.random.normal(key, (2, 4, 16, 16), dtype=jnp.float32)

    out = pooling_forward(x)
    out = jax.block_until_ready(out)

    ref = _reference(x)
    np.testing.assert_allclose(np.asarray(out), np.asarray(ref), rtol=1e-5, atol=1e-5)

    print("KERNEL_OK")
</pallas_src>

<mosaic_0001>
module attributes {stable_mosaic.version = 11 : i64} {
  func.func @_pooling_kernel(%arg0: i32, %arg1: memref<6x256xf32, #tpu.memory_space<vmem>>, %arg2: memref<8x256xf32, #tpu.memory_space<vmem>>, %arg3: memref<8x256xf32, #tpu.memory_space<vmem>>) attributes {dimension_semantics = [#tpu.dimension_semantics<parallel>], iteration_bounds = array<i64: 1>, scalar_prefetch = 0 : i64, scratch_operands = 0 : i64, tpu.core_type = #tpu.core_type<tc>, window_params = [{pipeline_mode = #tpu.pipeline_mode<synchronous>, transform_indices = @transform_0, window_bounds = array<i64: 6, 256>}, {transform_indices = @transform_1, window_bounds = array<i64: 8, 256>}, {transform_indices = @transform_2, window_bounds = array<i64: 8, 256>}]} {
    %c0 = arith.constant 0 : index
    %c0_0 = arith.constant 0 : index
    %0 = vector.load %arg2[%c0, %c0_0] : memref<8x256xf32, #tpu.memory_space<vmem>>, vector<8x256xf32>
    %c5 = arith.constant 5 : index
    %c0_1 = arith.constant 0 : index
    %1 = vector.load %arg1[%c5, %c0_1] : memref<6x256xf32, #tpu.memory_space<vmem>>, vector<1x256xf32>
    %c1_i32 = arith.constant 1 : i32
    %2 = tpu.dynamic_rotate %1 by %c1_i32 dim 1 : vector<1x256xf32>, i32 -> vector<1x256xf32>
    %3 = vector.extract_strided_slice %2 {offsets = [0, 1], sizes = [1, 1], strides = [1, 1]} : vector<1x256xf32> to vector<1x1xf32>
    %cst = arith.constant 0.000000e+00 : f32
    %4 = vector.broadcast %cst : f32 to vector<1x1xf32>
    %5 = arith.cmpf oeq, %3, %4 : vector<1x1xf32>
    %6 = arith.extui %5 : vector<1x1xi1> to vector<1x1xi32>
    %7 = arith.sitofp %6 : vector<1x1xi32> to vector<1x1xf32>
    %c0_2 = arith.constant 0 : index
    %c0_3 = arith.constant 0 : index
    %8 = vector.load %arg1[%c0_2, %c0_3] : memref<6x256xf32, #tpu.memory_space<vmem>>, vector<1x256xf32>
    %c1 = arith.constant 1 : index
    %c0_4 = arith.constant 0 : index
    %9 = vector.load %arg1[%c1, %c0_4] : memref<6x256xf32, #tpu.memory_space<vmem>>, vector<1x256xf32>
    %c1_i32_5 = arith.constant 1 : i32
    %10 = tpu.dynamic_rotate %0 by %c1_i32_5 dim 1 : vector<8x256xf32>, i32 -> vector<8x256xf32>
    %c255_i32 = arith.constant 255 : i32
    %11 = tpu.dynamic_rotate %0 by %c255_i32 dim 1 : vector<8x256xf32>, i32 -> vector<8x256xf32>
    %12 = vector.broadcast %7 : vector<1x1xf32> to vector<1x256xf32>
    %13 = arith.mulf %8, %12 : vector<1x256xf32>
    %cst_6 = arith.constant 1.000000e+00 : f32
    %14 = vector.broadcast %cst_6 : f32 to vector<1x1xf32>
    %15 = arith.subf %14, %7 : vector<1x1xf32>
    %16 = vector.broadcast %15 : vector<1x1xf32> to vector<1x256xf32>
    %17 = arith.mulf %9, %16 : vector<1x256xf32>
    %18 = arith.addf %13, %17 : vector<1x256xf32>
    %19 = vector.broadcast %7 : vector<1x1xf32> to vector<1x256xf32>
    %20 = arith.mulf %9, %19 : vector<1x256xf32>
    %cst_7 = arith.constant 1.000000e+00 : f32
    %21 = vector.broadcast %cst_7 : f32 to vector<1x1xf32>
    %22 = arith.subf %21, %7 : vector<1x1xf32>
    %23 = vector.broadcast %22 : vector<1x1xf32> to vector<1x256xf32>
    %24 = arith.mulf %8, %23 : vector<1x256xf32>
    %25 = arith.addf %20, %24 : vector<1x256xf32>
    %26 = vector.broadcast %18 : vector<1x256xf32> to vector<8x256xf32>
    %27 = arith.mulf %10, %26 : vector<8x256xf32>
    %28 = arith.addf %0, %27 : vector<8x256xf32>
    %29 = vector.broadcast %25 : vector<1x256xf32> to vector<8x256xf32>
    %30 = arith.mulf %11, %29 : vector<8x256xf32>
    %31 = arith.addf %28, %30 : vector<8x256xf32>
    %c2 = arith.constant 2 : index
    %c0_8 = arith.constant 0 : index
    %32 = vector.load %arg1[%c2, %c0_8] : memref<6x256xf32, #tpu.memory_space<vmem>>, vector<1x256xf32>
    %c3 = arith.constant 3 : index
    %c0_9 = arith.constant 0 : index
    %33 = vector.load %arg1[%c3, %c0_9] : memref<6x256xf32, #tpu.memory_space<vmem>>, vector<1x256xf32>
    %c16_i32 = arith.constant 16 : i32
    %34 = tpu.dynamic_rotate %31 by %c16_i32 dim 1 : vector<8x256xf32>, i32 -> vector<8x256xf32>
    %c240_i32 = arith.constant 240 : i32
    %35 = tpu.dynamic_rotate %31 by %c240_i32 dim 1 : vector<8x256xf32>, i32 -> vector<8x256xf32>
    %36 = vector.broadcast %7 : vector<1x1xf32> to vector<1x256xf32>
    %37 = arith.mulf %32, %36 : vector<1x256xf32>
    %cst_10 = arith.constant 1.000000e+00 : f32
    %38 = vector.broadcast %cst_10 : f32 to vector<1x1xf32>
    %39 = arith.subf %38, %7 : vector<1x1xf32>
    %40 = vector.broadcast %39 : vector<1x1xf32> to vector<1x256xf32>
    %41 = arith.mulf %33, %40 : vector<1x256xf32>
    %42 = arith.addf %37, %41 : vector<1x256xf32>
    %43 = vector.broadcast %7 : vector<1x1xf32> to vector<1x256xf32>
    %44 = arith.mulf %33, %43 : vector<1x256xf32>
    %cst_11 = arith.constant 1.000000e+00 : f32
    %45 = vector.broadcast %cst_11 : f32 to vector<1x1xf32>
    %46 = arith.subf %45, %7 : vector<1x1xf32>
    %47 = vector.broadcast %46 : vector<1x1xf32> to vector<1x256xf32>
    %48 = arith.mulf %32, %47 : vector<1x256xf32>
    %49 = arith.addf %44, %48 : vector<1x256xf32>
    %50 = vector.broadcast %42 : vector<1x256xf32> to vector<8x256xf32>
    %51 = arith.mulf %34, %50 : vector<8x256xf32>
    %52 = arith.addf %31, %51 : vector<8x256xf32>
    %53 = vector.broadcast %49 : vector<1x256xf32> to vector<8x256xf32>
    %54 = arith.mulf %35, %53 : vector<8x256xf32>
    %55 = arith.addf %52, %54 : vector<8x256xf32>
    %c4 = arith.constant 4 : index
    %c0_12 = arith.constant 0 : index
    %56 = vector.load %arg1[%c4, %c0_12] : memref<6x256xf32, #tpu.memory_space<vmem>>, vector<1x256xf32>
    %57 = vector.broadcast %56 : vector<1x256xf32> to vector<8x256xf32>
    %58 = arith.mulf %55, %57 : vector<8x256xf32>
    %59 = arith.subf %58, %0 : vector<8x256xf32>
    %c0_13 = arith.constant 0 : index
    %c0_14 = arith.constant 0 : index
    %60 = vector.load %arg3[%c0_13, %c0_14] : memref<8x256xf32, #tpu.memory_space<vmem>>, vector<8x256xf32>
    tpu.vector_store %arg3[%c0_13, %c0_14], %59 {strides = array<i32>} : memref<8x256xf32, #tpu.memory_space<vmem>>, vector<8x256xf32>,
    return
  }
  func.func @transform_0(%arg0: i32) -> (i32, i32) {
    %c0_i32 = arith.constant 0 : i32
    %c0_i32_0 = arith.constant 0 : i32
    %c0_i32_1 = arith.constant 0 : i32
    return %c0_i32, %c0_i32_0 : i32, i32
  }
  func.func @transform_1(%arg0: i32) -> (i32, i32) {
    %c0_i32 = arith.constant 0 : i32
    %c0_i32_0 = arith.constant 0 : i32
    return %arg0, %c0_i32 : i32, i32
  }
  func.func @transform_2(%arg0: i32) -> (i32, i32) {
    %c0_i32 = arith.constant 0 : i32
    %c0_i32_0 = arith.constant 0 : i32
    return %arg0, %c0_i32 : i32, i32
  }
}

</mosaic_0001>

<bundles_post_ra>
// kernel: tpu_custom_call.1
= control target key start
LH: loop header
LB: loop body
LE: loop exit
PB: predicated region body
PF: predicated region fallthrough
CT: control target
= control target key end

     0   :  { %7 = vsyncpa [#allocation3], 0  ;;  %s375_s0 = inlined_call_operand.hbm [shape: f32[6,256], index: 0, kind: input, shape index: {}]   ;;  %s376_s1 = inlined_call_operand.hbm [shape: f32[8,256], index: 1, kind: input, shape index: {}]   ;;  %s377_s2 = inlined_call_operand.hbm [shape: f32[8,256], index: 2, kind: output, shape index: {}]  }
   0x1   :  { %8 = vsyncpa [#allocation6], 0 }
   0x2   :  { %9 = vsyncpa [#allocation4], 0  ;;  %s300_s9 = smov [#allocation2]   ;;  %s301_s11 = smov [#allocation5]  }
   0x3   :  { %s16_s10 = sshll.u32 %s300_s9, 4  ;;  %s26_s12 = sshll.u32 %s301_s11, 4  ;;  %s17_s10 = int_to_ptr.vmem [resolvable:$true] %s16_s10  ;;  %s27_s12 = int_to_ptr.vmem [resolvable:$true] %s26_s12 }
   0x4   :  { %s242_s13 = scalar_lea.vmem %s17_s10, 256  ;;  %p247_p1 = scmp.lt.s32.totalorder %s17_s10, %s17_s10 }
   0x5   :  { %p243_p0 = scmp.ne.s32.totalorder %s17_s10, %s242_s13  ;;  %p248_p2 = scmp.lt.s32.totalorder %s242_s13, %s242_s13 }
   0x7   :  { %p249_p3 = por %p248_p2, %p247_p1 }
   0x9   :  { %p250_p4 = pnand %p249_p3, %p243_p0 }
   0xb   :  { %253 = shalt.err (!%p250_p4)
}
   0xc   :  { %19 = dma.hbm_to_vmem [thread:$0]  %s375_s0, 256, %s17_s10, [#allocation3]  }
   0xd   :  { %s262_s16 = scalar_lea.vmem %s27_s12, 256  ;;  %p267_p6 = scmp.lt.s32.totalorder %s27_s12, %s27_s12 }
   0xe   :  { %p263_p5 = scmp.ne.s32.totalorder %s27_s12, %s262_s16  ;;  %p268_p7 = scmp.lt.s32.totalorder %s262_s16, %s262_s16 }
  0x10   :  { %p269_p8 = por %p268_p7, %p267_p6 }
  0x12   :  { %p270_p9 = pnand %p269_p8, %p263_p5 }
  0x14   :  { %273 = shalt.err (!%p270_p9)
}
  0x15   :  { %29 = dma.hbm_to_vmem [thread:$0]  %s376_s1, 256, %s27_s12, [#allocation6]  }
  0x16   :  { %294 = dma.done.wait [#allocation3], 256  }
  0x17   :  { %295 = vsyncadd [#allocation3], 4294967040 }
  0x18   :  { %296 = dma.done.wait [#allocation6], 256  }
  0x19   :  { %297 = vsyncadd [#allocation6], 4294967040  ;;  %v41_v0 = vlaneseq  ;;  %v302_v1 = vmov 1   ;;  %v39_v5 = vld [vmem:[#allocation2 + $0x5] ss:$8 sm:$0x3] }
  0x1a   :  { %232 = vset.pattern.permute.xlu1 %v302_v1  ;;  %233 = vset.pattern.permute.xlu0 %v302_v1  ;;  %s303_s0 = smov 1   ;;  %v336_v8 = vld [vmem:[#allocation5] sm:$0xff]  ;;  %s304_s1 = smov 127   ;;  %v305_v13 = vmov 0.0   ;;  %v345_v16 = vld [vmem:[#allocation5 + $0x8] sm:$0xff] }
  0x1b   :  { %v42_v2 = vshrl.u32 %v41_v0, 7  ;;  %v340_v9 = vand.u32 127, %v41_v0  ;;  %v62_v19 = vld [vmem:[#allocation2] ss:$8 sm:$0x3]  ;;  %s306_s19 = smov 16  }
  0x1c   :  { %v64_v20 = vld [vmem:[#allocation2 + $0x1] ss:$8 sm:$0x3]  ;;  %v134_v23 = vld [vmem:[#allocation2 + $0x2] ss:$8 sm:$0x3] }
  0x1d   :  { %v330_v3 = vsub.s32 0, %v42_v2  ;;  %v332_v4 = vsub.s32 1, %v42_v2  ;;  %vm57_vm0 = vcmp.lt.s32.totalorder %v340_v9, 1  ;;  %v136_v24 = vld [vmem:[#allocation2 + $0x3] ss:$8 sm:$0x3] }
  0x1e   :  { %vm75_vm2 = vcmp.lt.s32.totalorder %v340_v9, 127  ;;  %s307_s20 = smov 112   ;;  %vm141_vm3 = vcmp.lt.s32.totalorder %v340_v9, 16  ;;  %vm148_vm4 = vcmp.lt.s32.totalorder %v340_v9, 112  ;;  %s308_s21 = smov [#allocation7]  }
  0x1f   :  { %v44_v6 = vrot.slane %v39_v5, %v330_v3  ;;  %v48_v7 = vrot.slane %v39_v5, %v332_v4  ;;  %v188_v1 = vld [vmem:[#allocation2 + $0x4] ss:$8 sm:$0x3]  ;;  %s212_s22 = sshll.u32 %s308_s21, 4  ;;  %s213_s22 = int_to_ptr.vmem [resolvable:$true] %s212_s22 }
  0x20   :  { %s274_s23 = scalar_lea.vmem %s213_s22, 256  ;;  %p279_p11 = scmp.lt.s32.totalorder %s213_s22, %s213_s22 }
  0x21   :  { %51 = vrot.lane.b32.xlu0 %v44_v6, %s303_s0  ;;  %p275_p10 = scmp.ne.s32.totalorder %s213_s22, %s274_s23  ;;  %p280_p12 = scmp.lt.s32.totalorder %s274_s23, %s274_s23 }
  0x23   :  { %p281_p13 = por %p280_p12, %p279_p11 }
  0x25   :  { %53 = vrot.lane.b32.xlu0 %v48_v7, %s303_s0  ;;  %p282_p0 = pnand %p281_p13, %p275_p10 }
  0x29   :  { %65 = vrot.lane.b32.xlu0 %v336_v8, %s303_s0 }
  0x2d   :  { %71 = vrot.lane.b32.xlu0 %v336_v8, %s304_s1 }
  0x93   :  { %v52_v10 = vpop.permute.xlu0 %51 }
  0x97   :  { %v54_v11 = vpop.permute.xlu0 %53 }
  0x98   :  { %v58_v12 = vsel %vm57_vm0, %v54_v11, %v52_v10  ;;  %v193_v10 = vrot.slane %v188_v1, %v330_v3  ;;  %v197_v11 = vrot.slane %v188_v1, %v332_v4 }
  0x99   :  { %vm59_vm1 = vcmp.eq.f32.partialorder %v58_v12, 0.0 }
  0x9a   :  { %v222_v14 = vsel %vm59_vm1, 1.0, %v305_v13 }
  0x9b   :  { %80 = vperm.xlu1 %232, %v222_v14   ;;  %v88_v15 = vsub.f32 1.0, %v222_v14  ;;  %v66_v22 = vpop.permute.xlu0 %65 }
  0x9f   :  { %91 = vperm.xlu1 %232, %v88_v15   ;;  %v72_v37 = vpop.permute.xlu0 %71 }
  0xa3   :  { %67 = vrot.lane.b32.xlu1 %v345_v16, %s303_s0 }
  0xa7   :  { %73 = vrot.lane.b32.xlu1 %v345_v16, %s304_s1 }
 0x116   :  { %v81_v17 = vpop.permute.xlu1 %80 }
 0x117   :  { %v85_v18 = vrot.slane %v81_v17, %v330_v3 }
 0x119   :  { %v87_v26 = vmul.f32 %v85_v18, %v62_v19  ;;  %v100_v27 = vmul.f32 %v85_v18, %v64_v20  ;;  %v151_v32 = vmul.f32 %v134_v23, %v85_v18  ;;  %v154_v33 = vmul.f32 %v136_v24, %v85_v18 }
 0x11a   :  { %v92_v21 = vpop.permute.xlu1 %91 }
 0x11b   :  { %v96_v25 = vrot.slane %v92_v21, %v330_v3 }
 0x11d   :  { %v98_v28 = vmul.f32 %v96_v25, %v64_v20  ;;  %v101_v29 = vmul.f32 %v96_v25, %v62_v19  ;;  %v152_v30 = vmul.f32 %v136_v24, %v96_v25  ;;  %v155_v31 = vmul.f32 %v134_v23, %v96_v25 }
 0x11e   :  { %v68_v34 = vpop.permute.xlu1 %67 }
 0x11f   :  { %v99_v35 = vadd.f32 %v98_v28, %v87_v26  ;;  %v102_v36 = vadd.f32 %v101_v29, %v100_v27  ;;  %v153_v38 = vadd.f32 %v152_v30, %v151_v32  ;;  %v156_v39 = vadd.f32 %v155_v31, %v154_v33 }
 0x120   :  { %v69_v44 = vsel %vm57_vm0, %v66_v22, %v68_v34  ;;  %v70_v45 = vsel %vm57_vm0, %v68_v34, %v66_v22 }
 0x121   :  { %v107_v40 = vrot.slane %v99_v35, %v330_v3  ;;  %v111_v41 = vrot.slane %v99_v35, %v332_v4  ;;  %v122_v42 = vrot.slane %v102_v36, %v330_v3  ;;  %v126_v43 = vrot.slane %v102_v36, %v332_v4 }
 0x122   :  { %v74_v46 = vpop.permute.xlu1 %73  ;;  %v161_v58 = vrot.slane %v153_v38, %v330_v3  ;;  %v165_v59 = vrot.slane %v153_v38, %v332_v4  ;;  %v176_v5 = vrot.slane %v156_v39, %v330_v3  ;;  %v180_v6 = vrot.slane %v156_v39, %v332_v4 }
 0x123   :  { %v114_v47 = vmul.f32 %v107_v40, %v70_v45  ;;  %v115_v48 = vmul.f32 %v111_v41, %v69_v44  ;;  %v76_v49 = vsel %vm75_vm2, %v72_v37, %v74_v46  ;;  %v77_v50 = vsel %vm75_vm2, %v74_v46, %v72_v37 }
 0x124   :  { %v129_v51 = vmul.f32 %v122_v42, %v76_v49  ;;  %v130_v52 = vmul.f32 %v126_v43, %v77_v50 }
 0x125   :  { %v116_v53 = vadd.f32 %v114_v47, %v336_v8  ;;  %v117_v54 = vadd.f32 %v115_v48, %v345_v16 }
 0x127   :  { %v132_v55 = vadd.f32 %v130_v52, %v117_v54  ;;  %v131_v56 = vadd.f32 %v129_v51, %v116_v53 }
 0x129   :  { %139 = vrot.lane.b32.xlu1 %v132_v55, %s306_s19  ;;  %137 = vrot.lane.b32.xlu0 %v131_v56, %s306_s19 }
 0x12d   :  { %146 = vrot.lane.b32.xlu1 %v132_v55, %s307_s20  ;;  %144 = vrot.lane.b32.xlu0 %v131_v56, %s307_s20 }
 0x19b   :  { %v140_v57 = vpop.permute.xlu1 %139  ;;  %v138_v60 = vpop.permute.xlu0 %137 }
 0x19c   :  { %v142_v61 = vsel %vm141_vm3, %v138_v60, %v140_v57  ;;  %v143_v62 = vsel %vm141_vm3, %v140_v57, %v138_v60 }
 0x19d   :  { %v168_v63 = vmul.f32 %v161_v58, %v143_v62  ;;  %v169_v0 = vmul.f32 %v165_v59, %v142_v61 }
 0x19f   :  { %v147_v2 = vpop.permute.xlu1 %146  ;;  %v145_v7 = vpop.permute.xlu0 %144  ;;  %v170_v14 = vadd.f32 %v168_v63, %v131_v56  ;;  %v171_v15 = vadd.f32 %v169_v0, %v132_v55 }
 0x1a0   :  { %v149_v12 = vsel %vm148_vm4, %v145_v7, %v147_v2  ;;  %v150_v13 = vsel %vm148_vm4, %v147_v2, %v145_v7 }
 0x1a1   :  { %v183_v17 = vmul.f32 %v176_v5, %v149_v12  ;;  %v184_v18 = vmul.f32 %v180_v6, %v150_v13 }
 0x1a3   :  { %v185_v19 = vadd.f32 %v183_v17, %v170_v14  ;;  %v186_v20 = vadd.f32 %v184_v18, %v171_v15 }
 0x1a5   :  { %v200_v9 = vmul.f32 %v193_v10, %v185_v19  ;;  %v201_v21 = vmul.f32 %v197_v11, %v186_v20 }
 0x1a7   :  { %v202_v22 = vsub.f32 %v200_v9, %v336_v8  ;;  %v203_v23 = vsub.f32 %v201_v21, %v345_v16 }
 0x1a9   :  { %204 = vst [vmem:[#allocation7] sm:$0xff] %v202_v22  ;;  %205 = vst [vmem:[#allocation7 + $0x8] sm:$0xff] %v203_v23 }
 0x1aa   :  { %285 = shalt.err (!%p282_p0)
}
 0x1ab   :  { %215 = dma.vmem_to_hbm [thread:$0]  %s213_s22, 256, %s377_s2, [#allocation4]  }
 0x1ac   :  { %298 = dma.done.wait [#allocation4], 256  }
 0x1ad   :  { %299 = vsyncadd [#allocation4], 4294967040 }
 0x1ae   :  { %219 = vsyncpa [#allocation3], 1 }
 0x1af   :  { %220 = vsyncpa [#allocation6], 1 }
 0x1b0   :  { %221 = vsyncpa [#allocation4], 1 }

</bundles_post_ra>
